<compile_context>
chip_gen: v6e
topology: v6e:2x2x1
jax: 0.10.0
libtpu: 0.0.40
codegen_flags: <defaults>
</compile_context>

<pallas_src>
import functools

import jax
import jax.numpy as jnp
from jax.experimental import pallas as pl
from jax.experimental.pallas import tpu as pltpu


# ----------------------------------------------------------------------------
# Fused Pallas kernel: entire GNN forward
# ----------------------------------------------------------------------------
def _gnn_fused_kernel(n_layers, edge_dim, inter_dim, all_dim,
                      row_ref, col_ref, batch_ref, ebatch_ref, ea_ref, *refs):
    """refs = [w1a_0,w1b_0,b1_0,w2_0,b2_0, ..., ow1a,ow1b,ob1,ow2,ob2,ow3,ob3,
               slab_ref, h_all, e_all, xrow]."""
    f32 = jnp.float32
    lp = refs[:5 * n_layers]
    ow1a, ow1b, ob1, ow2, ob2, ow3, ob3 = refs[5 * n_layers:5 * n_layers + 7]
    slab_ref = refs[5 * n_layers + 7]
    h_all, e_all, xrow = refs[5 * n_layers + 8:]

    E = ea_ref.shape[0]
    N = batch_ref.shape[1]
    G = slab_ref.shape[0]

    col = col_ref[...]        # (1, E) int32, lane-dense
    batch = batch_ref[...]    # (1, N) int32
    ebatch = ebatch_ref[...]  # (1, E) int32

    # On-chip one-hot matrices (UNnormalised) + f32 inverse-count column scales.
    oh_colT = (jax.lax.broadcasted_iota(jnp.int32, (N, E), 0) == col).astype(f32)
    inv_deg = 1.0 / jnp.maximum(jnp.sum(oh_colT, axis=1, keepdims=True), 1.0)
    oh_bT = (jax.lax.broadcasted_iota(jnp.int32, (G, N), 0) == batch).astype(f32)
    inv_cnt_n = 1.0 / jnp.maximum(jnp.sum(oh_bT, axis=1, keepdims=True), 1.0)
    oh_ebT = (jax.lax.broadcasted_iota(jnp.int32, (G, E), 0) == ebatch).astype(f32)
    inv_cnt_e = 1.0 / jnp.maximum(jnp.sum(oh_ebT, axis=1, keepdims=True), 1.0)

    # Per-layer slabs (column slices hold each layer's h / edge_attr).
    h_all[...] = jnp.zeros_like(h_all)

    ea = ea_ref[...]                                                    # (E, Fe)
    e_all[:, 0:edge_dim] = ea

    # Input layer: h0 = scatter_mean(edge_attr, col).
    h0 = jnp.dot(oh_colT, ea, preferred_element_type=f32) * inv_deg     # (N, Fe)
    h_all[:, 0:edge_dim] = h0

    ea_val = ea
    col_off = 0
    feat = edge_dim
    for l in range(n_layers):
        w1a, w1b, b1, w2, b2 = lp[5 * l:5 * l + 5]

        # Row gather x[row]: scalar loop over edges, SMEM indices, dynamic
        # sublane row copy from the VMEM-resident node slab (no (E,N) mask).
        def gather_body(e, carry):
            idx = row_ref[e]
            xrow[pl.ds(e, 1), :] = h_all[pl.ds(idx, 1), :]
            return carry
        jax.lax.fori_loop(0, E, gather_body, 0)

        x_row = xrow[:, col_off:col_off + feat]                         # (E, Fn)
        # Split-W1 form of Lin(cat([x[row], edge_attr])) -> hid (no concat).
        z = (jnp.dot(x_row, w1a[...], preferred_element_type=f32)
             + jnp.dot(ea_val, w1b[...], preferred_element_type=f32)
             + b1[...])
        z = jnp.maximum(z, 0.0)                                         # ReLU
        e_new = jnp.dot(z, w2[...], preferred_element_type=f32) + b2[...]

        new_off = col_off + feat
        e_all[:, new_off:new_off + inter_dim] = e_new
        h_new = jnp.dot(oh_colT, e_new, preferred_element_type=f32) * inv_deg
        h_all[:, new_off:new_off + inter_dim] = h_new

        ea_val = e_new
        col_off = new_off
        feat = inter_dim

    # Single fused graph-mean pooling over the full per-layer slabs.
    pooled_n = jnp.dot(oh_bT, h_all[...], preferred_element_type=f32) * inv_cnt_n
    pooled_e = jnp.dot(oh_ebT, e_all[...], preferred_element_type=f32) * inv_cnt_e

    # Output MLP: Lin -> ReLU -> Lin -> ReLU -> Lin (split first layer again).
    zz = (jnp.dot(pooled_n, ow1a[...], preferred_element_type=f32)
          + jnp.dot(pooled_e, ow1b[...], preferred_element_type=f32) + ob1[...])
    zz = jnp.maximum(zz, 0.0)
    zz = jnp.maximum(jnp.dot(zz, ow2[...], preferred_element_type=f32) + ob2[...],
                     0.0)
    out = jnp.dot(zz, ow3[...], preferred_element_type=f32) + ob3[...]

    # Lane-dense single output slab: [pooled_node | pooled_edge | out].
    slab_ref[:, 0:all_dim] = pooled_n
    slab_ref[:, all_dim:2 * all_dim] = pooled_e
    slab_ref[:, 2 * all_dim:] = out


# ----------------------------------------------------------------------------
# Wrapper
# ----------------------------------------------------------------------------
def gnn_forward(x, edge_index, edge_attr, batch, edge_attr_batch,
                layer_params, out_params, num_graphs):
    # TODO(synk): out_dim=None path (no output MLP) is not wired into the fused
    # kernel; the module default out_dim=None would need a second kernel variant.
    assert out_params is not None

    N = x.shape[0]
    E, edge_dim = edge_attr.shape
    G = int(num_graphs)
    n_layers = len(layer_params)
    inter = layer_params[0][2].shape[1]
    hid = layer_params[0][0].shape[1]
    out_dim = out_params[4].shape[1]
    all_dim = edge_dim + n_layers * inter          # per node / per edge slab

    row = edge_index[0].astype(jnp.int32).reshape(E)       # SMEM scalar indices
    col = edge_index[1].astype(jnp.int32).reshape(1, E)    # lane-dense
    batch2 = batch.astype(jnp.int32).reshape(1, N)
    ebatch2 = edge_attr_batch.astype(jnp.int32).reshape(1, E)

    # Pre-split every Lin(node || edge) weight so the kernel never concatenates.
    flat_w = []
    feat = edge_dim
    for (w1, b1, w2, b2) in layer_params:
        flat_w += [w1[:feat, :], w1[feat:, :], b1, w2, b2]
        feat = w2.shape[1]
    ow1, ob1, ow2, ob2, ow3, ob3 = out_params
    flat_w += [ow1[:all_dim, :], ow1[all_dim:, :], ob1, ow2, ob2, ow3, ob3]

    args = (row, col, batch2, ebatch2, edge_attr) + tuple(flat_w)

    # Advisory cost estimate for the fused custom call.
    flops = 2 * N * E * edge_dim                     # input scatter-mean
    feat = edge_dim
    for (w1, b1, w2, b2) in layer_params:
        it = w2.shape[1]
        flops += 2 * E * (2 * feat * hid + hid * it) # layer MLP (split W1)
        flops += 2 * N * E * it                      # scatter-mean
        feat = it
    flops += 2 * G * (N + E) * all_dim               # fused pooling
    flops += 2 * G * (2 * all_dim * hid + hid * hid + hid * out_dim)
    bytes_accessed = sum(int(a.size) * a.dtype.itemsize for a in args)
    bytes_accessed += G * (2 * all_dim + out_dim) * 4
    cost = pl.CostEstimate(flops=int(flops), transcendentals=0,
                           bytes_accessed=int(bytes_accessed))

    in_specs = ([pl.BlockSpec(memory_space=pltpu.MemorySpace.SMEM)]
                + [pl.BlockSpec(memory_space=pltpu.MemorySpace.VMEM)]
                * (len(args) - 1))

    kernel = functools.partial(_gnn_fused_kernel, n_layers, edge_dim, inter,
                               all_dim)
    slab = pl.pallas_call(
        kernel,
        out_shape=jax.ShapeDtypeStruct((G, 2 * all_dim + out_dim), jnp.float32),
        in_specs=in_specs,
        out_specs=pl.BlockSpec(memory_space=pltpu.MemorySpace.VMEM),
        scratch_shapes=[pltpu.VMEM((N, all_dim), jnp.float32),   # h per layer
                        pltpu.VMEM((E, all_dim), jnp.float32),   # edge per layer
                        pltpu.VMEM((E, all_dim), jnp.float32)],  # gathered x[row]
        cost_estimate=cost,
    )(*args)

    all_node = slab[:, :all_dim]
    all_edge = slab[:, all_dim:2 * all_dim]
    out = slab[:, 2 * all_dim:]
    return all_node, all_edge, out


# ----------------------------------------------------------------------------
# Pure-JAX reference (for correctness check)
# ----------------------------------------------------------------------------
def _seg_mean(x, idx, num):
    s = jax.ops.segment_sum(x, idx, num_segments=num)
    c = jax.ops.segment_sum(jnp.ones((x.shape[0], 1), x.dtype), idx,
                            num_segments=num)
    return s / jnp.maximum(c, 1.0)


def gnn_reference(x, edge_index, edge_attr, batch, edge_attr_batch,
                  layer_params, out_params, num_graphs):
    N = x.shape[0]
    row, col = edge_index[0], edge_index[1]
    h = _seg_mean(edge_attr, col, N)
    gna = [_seg_mean(h, batch, num_graphs)]
    gea = [_seg_mean(edge_attr, edge_attr_batch, num_graphs)]
    ea = edge_attr
    for (w1, b1, w2, b2) in layer_params:
        e_in = jnp.concatenate([h[row], ea], axis=-1)
        z = jnp.maximum(e_in @ w1 + b1, 0.0)
        e_new = z @ w2 + b2
        h = _seg_mean(e_new, col, N)
        ea = e_new
        gna.append(_seg_mean(h, batch, num_graphs))
        gea.append(_seg_mean(ea, edge_attr_batch, num_graphs))
    all_node = jnp.concatenate(gna, -1)
    all_edge = jnp.concatenate(gea, -1)
    all_attr = jnp.concatenate([all_node, all_edge], -1)
    out = None
    if out_params is not None:
        w1, b1, w2, b2, w3, b3 = out_params
        z = jnp.maximum(all_attr @ w1 + b1, 0.0)
        z = jnp.maximum(z @ w2 + b2, 0.0)
        out = z @ w3 + b3
    return all_node, all_edge, out


# ----------------------------------------------------------------------------
if __name__ == "__main__":
    N_LAYERS = 2
    EDGE_DIM = 8
    HID_DIM = 32
    INTER_DIM = EDGE_DIM        # inter_dim=None -> edge_dim
    OUT_DIM = 4
    N_NODES = 16
    N_EDGES = 48
    N_GRAPHS = 2
    NODE_FEAT = 4               # original x features (only x.size(0) is used)

    key = jax.random.PRNGKey(0)
    k_x, k_ei, k_ea, k_p = jax.random.split(key, 4)

    x = jax.random.normal(k_x, (N_NODES, NODE_FEAT), jnp.float32)
    edge_index = jax.random.randint(k_ei, (2, N_EDGES), 0, N_NODES, jnp.int32)
    edge_attr = jax.random.normal(k_ea, (N_EDGES, EDGE_DIM), jnp.float32)
    batch = jnp.concatenate([jnp.zeros(N_NODES // 2, jnp.int32),
                             jnp.ones(N_NODES - N_NODES // 2, jnp.int32)])
    edge_attr_batch = batch[edge_index[1]]

    # --- deterministic parameter init (norm=False, mark=False, linear=False) ---
    pk = jax.random.split(k_p, 4 * N_LAYERS + 6)
    layer_params = []
    node_dim = EDGE_DIM
    e_dim = EDGE_DIM
    idx = 0
    for _ in range(N_LAYERS):
        # Merged W1 for Lin(node_dim + edge_dim, hid) (wrapper splits it).
        w1 = 0.1 * jax.random.normal(pk[idx], (node_dim + e_dim, HID_DIM),
                                     jnp.float32); idx += 1
        b1 = 0.1 * jax.random.normal(pk[idx], (1, HID_DIM), jnp.float32); idx += 1
        w2 = 0.1 * jax.random.normal(pk[idx], (HID_DIM, INTER_DIM),
                                     jnp.float32); idx += 1
        b2 = 0.1 * jax.random.normal(pk[idx], (1, INTER_DIM), jnp.float32); idx += 1
        layer_params.append((w1, b1, w2, b2))
        node_dim = INTER_DIM
        e_dim = INTER_DIM

    mlp_in_dim = 2 * EDGE_DIM + 2 * INTER_DIM * N_LAYERS   # node_factor=1 ('mean')
    ow1 = 0.1 * jax.random.normal(pk[idx], (mlp_in_dim, HID_DIM), jnp.float32); idx += 1
    ob1 = jnp.zeros((1, HID_DIM), jnp.float32)
    ow2 = 0.1 * jax.random.normal(pk[idx], (HID_DIM, HID_DIM), jnp.float32); idx += 1
    ob2 = jnp.zeros((1, HID_DIM), jnp.float32)
    ow3 = 0.1 * jax.random.normal(pk[idx], (HID_DIM, OUT_DIM), jnp.float32); idx += 1
    ob3 = jnp.zeros((1, OUT_DIM), jnp.float32)
    out_params = (ow1, ob1, ow2, ob2, ow3, ob3)

    # --- run fused Pallas forward ---
    all_node, all_edge, out = gnn_forward(
        x, edge_index, edge_attr, batch, edge_attr_batch,
        layer_params, out_params, N_GRAPHS)
    jax.block_until_ready((all_node, all_edge, out))

    # --- correctness check against pure-JAX reference ---
    rn, re, ro = gnn_reference(
        x, edge_index, edge_attr, batch, edge_attr_batch,
        layer_params, out_params, N_GRAPHS)
    assert jnp.allclose(all_node, rn, atol=1e-4, rtol=1e-4)
    assert jnp.allclose(all_edge, re, atol=1e-4, rtol=1e-4)
    assert jnp.allclose(out, ro, atol=1e-4, rtol=1e-4)

    print("KERNEL_OK")
</pallas_src>

<mosaic_0001>
module attributes {stable_mosaic.version = 11 : i64} {
  func.func @_gnn_fused_kernel(%arg0: memref<48xi32, #tpu.memory_space<smem>>, %arg1: memref<1x48xi32, #tpu.memory_space<vmem>>, %arg2: memref<1x16xi32, #tpu.memory_space<vmem>>, %arg3: memref<1x48xi32, #tpu.memory_space<vmem>>, %arg4: memref<48x8xf32, #tpu.memory_space<vmem>>, %arg5: memref<8x32xf32, #tpu.memory_space<vmem>>, %arg6: memref<8x32xf32, #tpu.memory_space<vmem>>, %arg7: memref<1x32xf32, #tpu.memory_space<vmem>>, %arg8: memref<32x8xf32, #tpu.memory_space<vmem>>, %arg9: memref<1x8xf32, #tpu.memory_space<vmem>>, %arg10: memref<8x32xf32, #tpu.memory_space<vmem>>, %arg11: memref<8x32xf32, #tpu.memory_space<vmem>>, %arg12: memref<1x32xf32, #tpu.memory_space<vmem>>, %arg13: memref<32x8xf32, #tpu.memory_space<vmem>>, %arg14: memref<1x8xf32, #tpu.memory_space<vmem>>, %arg15: memref<24x32xf32, #tpu.memory_space<vmem>>, %arg16: memref<24x32xf32, #tpu.memory_space<vmem>>, %arg17: memref<1x32xf32, #tpu.memory_space<vmem>>, %arg18: memref<32x32xf32, #tpu.memory_space<vmem>>, %arg19: memref<1x32xf32, #tpu.memory_space<vmem>>, %arg20: memref<32x4xf32, #tpu.memory_space<vmem>>, %arg21: memref<1x4xf32, #tpu.memory_space<vmem>>, %arg22: memref<2x52xf32, #tpu.memory_space<vmem>>, %arg23: memref<16x24xf32, #tpu.memory_space<vmem>>, %arg24: memref<48x24xf32, #tpu.memory_space<vmem>>, %arg25: memref<48x24xf32, #tpu.memory_space<vmem>>) attributes {dimension_semantics = [], scalar_prefetch = 0 : i64, scratch_operands = 3 : i64, tpu.core_type = #tpu.core_type<tc>} {
    %c0 = arith.constant 0 : index
    %c0_0 = arith.constant 0 : index
    %0 = vector.load %arg1[%c0, %c0_0] : memref<1x48xi32, #tpu.memory_space<vmem>>, vector<1x48xi32>
    %c0_1 = arith.constant 0 : index
    %c0_2 = arith.constant 0 : index
    %1 = vector.load %arg2[%c0_1, %c0_2] : memref<1x16xi32, #tpu.memory_space<vmem>>, vector<1x16xi32>
    %c0_3 = arith.constant 0 : index
    %c0_4 = arith.constant 0 : index
    %2 = vector.load %arg3[%c0_3, %c0_4] : memref<1x48xi32, #tpu.memory_space<vmem>>, vector<1x48xi32>
    %3 = tpu.iota {dimensions = array<i32: 0>} : vector<16x48xi32>
    %4 = vector.broadcast %0 : vector<1x48xi32> to vector<16x48xi32>
    %5 = arith.cmpi eq, %3, %4 : vector<16x48xi32>
    %6 = arith.extui %5 : vector<16x48xi1> to vector<16x48xi32>
    %7 = arith.sitofp %6 : vector<16x48xi32> to vector<16x48xf32>
    %cst = arith.constant dense<0.000000e+00> : vector<16xf32>
    %8 = vector.multi_reduction <add>, %7, %cst [1] : vector<16x48xf32> to vector<16xf32>
    %9 = vector.shape_cast %8 : vector<16xf32> to vector<16x1xf32>
    %cst_5 = arith.constant 1.000000e+00 : f32
    %10 = vector.broadcast %cst_5 : f32 to vector<16x1xf32>
    %11 = arith.maximumf %9, %10 : vector<16x1xf32>
    %cst_6 = arith.constant 1.000000e+00 : f32
    %12 = vector.broadcast %cst_6 : f32 to vector<16x1xf32>
    %13 = arith.divf %12, %11 : vector<16x1xf32>
    %14 = tpu.iota {dimensions = array<i32: 0>} : vector<2x16xi32>
    %15 = vector.broadcast %1 : vector<1x16xi32> to vector<2x16xi32>
    %16 = arith.cmpi eq, %14, %15 : vector<2x16xi32>
    %17 = arith.extui %16 : vector<2x16xi1> to vector<2x16xi32>
    %18 = arith.sitofp %17 : vector<2x16xi32> to vector<2x16xf32>
    %cst_7 = arith.constant dense<0.000000e+00> : vector<2xf32>
    %19 = vector.multi_reduction <add>, %18, %cst_7 [1] : vector<2x16xf32> to vector<2xf32>
    %20 = vector.shape_cast %19 : vector<2xf32> to vector<2x1xf32>
    %cst_8 = arith.constant 1.000000e+00 : f32
    %21 = vector.broadcast %cst_8 : f32 to vector<2x1xf32>
    %22 = arith.maximumf %20, %21 : vector<2x1xf32>
    %cst_9 = arith.constant 1.000000e+00 : f32
    %23 = vector.broadcast %cst_9 : f32 to vector<2x1xf32>
    %24 = arith.divf %23, %22 : vector<2x1xf32>
    %25 = tpu.iota {dimensions = array<i32: 0>} : vector<2x48xi32>
    %26 = vector.broadcast %2 : vector<1x48xi32> to vector<2x48xi32>
    %27 = arith.cmpi eq, %25, %26 : vector<2x48xi32>
    %28 = arith.extui %27 : vector<2x48xi1> to vector<2x48xi32>
    %29 = arith.sitofp %28 : vector<2x48xi32> to vector<2x48xf32>
    %cst_10 = arith.constant dense<0.000000e+00> : vector<2xf32>
    %30 = vector.multi_reduction <add>, %29, %cst_10 [1] : vector<2x48xf32> to vector<2xf32>
    %31 = vector.shape_cast %30 : vector<2xf32> to vector<2x1xf32>
    %cst_11 = arith.constant 1.000000e+00 : f32
    %32 = vector.broadcast %cst_11 : f32 to vector<2x1xf32>
    %33 = arith.maximumf %31, %32 : vector<2x1xf32>
    %cst_12 = arith.constant 1.000000e+00 : f32
    %34 = vector.broadcast %cst_12 : f32 to vector<2x1xf32>
    %35 = arith.divf %34, %33 : vector<2x1xf32>
    %cst_13 = arith.constant 0.000000e+00 : f32
    %36 = vector.broadcast %cst_13 : f32 to vector<16x24xf32>
    %c0_14 = arith.constant 0 : index
    %c0_15 = arith.constant 0 : index
    %37 = vector.load %arg23[%c0_14, %c0_15] : memref<16x24xf32, #tpu.memory_space<vmem>>, vector<16x24xf32>
    tpu.vector_store %arg23[%c0_14, %c0_15], %36 {strides = array<i32>} : memref<16x24xf32, #tpu.memory_space<vmem>>, vector<16x24xf32>,
    %c0_16 = arith.constant 0 : index
    %c0_17 = arith.constant 0 : index
    %38 = vector.load %arg4[%c0_16, %c0_17] : memref<48x8xf32, #tpu.memory_space<vmem>>, vector<48x8xf32>
    %c0_18 = arith.constant 0 : index
    %c0_19 = arith.constant 0 : index
    %39 = vector.load %arg24[%c0_18, %c0_19] : memref<48x24xf32, #tpu.memory_space<vmem>>, vector<48x8xf32>
    tpu.vector_store %arg24[%c0_18, %c0_19], %38 {strides = array<i32>} : memref<48x24xf32, #tpu.memory_space<vmem>>, vector<48x8xf32>,
    %cst_20 = arith.constant dense<0.000000e+00> : vector<16x8xf32>
    %40 = tpu.matmul %7, %38, %cst_20 {dimension_numbers = #tpu.dot_dimension_numbers<[1], [0], [0], [1], [0, 0, 1, 1], [], []>} : vector<16x48xf32>, vector<48x8xf32>, vector<16x8xf32> -> vector<16x8xf32>
    %41 = vector.broadcast %13 : vector<16x1xf32> to vector<16x8xf32>
    %42 = arith.mulf %40, %41 : vector<16x8xf32>
    %c0_21 = arith.constant 0 : index
    %c0_22 = arith.constant 0 : index
    %43 = vector.load %arg23[%c0_21, %c0_22] : memref<16x24xf32, #tpu.memory_space<vmem>>, vector<16x8xf32>
    tpu.vector_store %arg23[%c0_21, %c0_22], %42 {strides = array<i32>} : memref<16x24xf32, #tpu.memory_space<vmem>>, vector<16x8xf32>,
    %c0_i32 = arith.constant 0 : i32
    %c48_i32 = arith.constant 48 : i32
    %44 = arith.addi %c0_i32, %c48_i32 : i32
    %c1_i32 = arith.constant 1 : i32
    scf.for %arg26 = %c0_i32 to %44 step %c1_i32  : i32 {
      %121 = arith.index_cast %arg26 : i32 to index
      %122 = memref.load %arg0[%121] : memref<48xi32, #tpu.memory_space<smem>>
      %123 = arith.index_cast %122 : i32 to index
      %c0_98 = arith.constant 0 : index
      %124 = vector.load %arg23[%123, %c0_98] : memref<16x24xf32, #tpu.memory_space<vmem>>, vector<1x24xf32>
      %125 = arith.index_cast %arg26 : i32 to index
      %c0_99 = arith.constant 0 : index
      %126 = vector.load %arg25[%125, %c0_99] : memref<48x24xf32, #tpu.memory_space<vmem>>, vector<1x24xf32>
      tpu.vector_store %arg25[%125, %c0_99], %124 {strides = array<i32>} : memref<48x24xf32, #tpu.memory_space<vmem>>, vector<1x24xf32>,
    }
    %c48_i32_23 = arith.constant 48 : i32
    %c0_24 = arith.constant 0 : index
    %c0_25 = arith.constant 0 : index
    %45 = vector.load %arg25[%c0_24, %c0_25] : memref<48x24xf32, #tpu.memory_space<vmem>>, vector<48x8xf32>
    %c0_26 = arith.constant 0 : index
    %c0_27 = arith.constant 0 : index
    %46 = vector.load %arg5[%c0_26, %c0_27] : memref<8x32xf32, #tpu.memory_space<vmem>>, vector<8x32xf32>
    %cst_28 = arith.constant dense<0.000000e+00> : vector<48x32xf32>
    %47 = tpu.matmul %45, %46, %cst_28 {dimension_numbers = #tpu.dot_dimension_numbers<[1], [0], [0], [1], [0, 0, 1, 1], [], []>} : vector<48x8xf32>, vector<8x32xf32>, vector<48x32xf32> -> vector<48x32xf32>
    %c0_29 = arith.constant 0 : index
    %c0_30 = arith.constant 0 : index
    %48 = vector.load %arg6[%c0_29, %c0_30] : memref<8x32xf32, #tpu.memory_space<vmem>>, vector<8x32xf32>
    %cst_31 = arith.constant dense<0.000000e+00> : vector<48x32xf32>
    %49 = tpu.matmul %38, %48, %cst_31 {dimension_numbers = #tpu.dot_dimension_numbers<[1], [0], [0], [1], [0, 0, 1, 1], [], []>} : vector<48x8xf32>, vector<8x32xf32>, vector<48x32xf32> -> vector<48x32xf32>
    %50 = arith.addf %47, %49 : vector<48x32xf32>
    %c0_32 = arith.constant 0 : index
    %c0_33 = arith.constant 0 : index
    %51 = vector.load %arg7[%c0_32, %c0_33] : memref<1x32xf32, #tpu.memory_space<vmem>>, vector<1x32xf32>
    %52 = vector.broadcast %51 : vector<1x32xf32> to vector<48x32xf32>
    %53 = arith.addf %50, %52 : vector<48x32xf32>
    %cst_34 = arith.constant 0.000000e+00 : f32
    %54 = vector.broadcast %cst_34 : f32 to vector<48x32xf32>
    %55 = arith.maximumf %53, %54 : vector<48x32xf32>
    %c0_35 = arith.constant 0 : index
    %c0_36 = arith.constant 0 : index
    %56 = vector.load %arg8[%c0_35, %c0_36] : memref<32x8xf32, #tpu.memory_space<vmem>>, vector<32x8xf32>
    %cst_37 = arith.constant dense<0.000000e+00> : vector<48x8xf32>
    %57 = tpu.matmul %55, %56, %cst_37 {dimension_numbers = #tpu.dot_dimension_numbers<[1], [0], [0], [1], [0, 0, 1, 1], [], []>} : vector<48x32xf32>, vector<32x8xf32>, vector<48x8xf32> -> vector<48x8xf32>
    %c0_38 = arith.constant 0 : index
    %c0_39 = arith.constant 0 : index
    %58 = vector.load %arg9[%c0_38, %c0_39] : memref<1x8xf32, #tpu.memory_space<vmem>>, vector<1x8xf32>
    %59 = vector.broadcast %58 : vector<1x8xf32> to vector<48x8xf32>
    %60 = arith.addf %57, %59 : vector<48x8xf32>
    %c0_40 = arith.constant 0 : index
    %c8 = arith.constant 8 : index
    %61 = vector.load %arg24[%c0_40, %c8] : memref<48x24xf32, #tpu.memory_space<vmem>>, vector<48x8xf32>
    tpu.vector_store %arg24[%c0_40, %c8], %60 {strides = array<i32>} : memref<48x24xf32, #tpu.memory_space<vmem>>, vector<48x8xf32>,
    %cst_41 = arith.constant dense<0.000000e+00> : vector<16x8xf32>
    %62 = tpu.matmul %7, %60, %cst_41 {dimension_numbers = #tpu.dot_dimension_numbers<[1], [0], [0], [1], [0, 0, 1, 1], [], []>} : vector<16x48xf32>, vector<48x8xf32>, vector<16x8xf32> -> vector<16x8xf32>
    %63 = vector.broadcast %13 : vector<16x1xf32> to vector<16x8xf32>
    %64 = arith.mulf %62, %63 : vector<16x8xf32>
    %c0_42 = arith.constant 0 : index
    %c8_43 = arith.constant 8 : index
    %65 = vector.load %arg23[%c0_42, %c8_43] : memref<16x24xf32, #tpu.memory_space<vmem>>, vector<16x8xf32>
    tpu.vector_store %arg23[%c0_42, %c8_43], %64 {strides = array<i32>} : memref<16x24xf32, #tpu.memory_space<vmem>>, vector<16x8xf32>,
    %c0_i32_44 = arith.constant 0 : i32
    %c48_i32_45 = arith.constant 48 : i32
    %66 = arith.addi %c0_i32_44, %c48_i32_45 : i32
    %c1_i32_46 = arith.constant 1 : i32
    scf.for %arg26 = %c0_i32_44 to %66 step %c1_i32_46  : i32 {
      %121 = arith.index_cast %arg26 : i32 to index
      %122 = memref.load %arg0[%121] : memref<48xi32, #tpu.memory_space<smem>>
      %123 = arith.index_cast %122 : i32 to index
      %c0_98 = arith.constant 0 : index
      %124 = vector.load %arg23[%123, %c0_98] : memref<16x24xf32, #tpu.memory_space<vmem>>, vector<1x24xf32>
      %125 = arith.index_cast %arg26 : i32 to index
      %c0_99 = arith.constant 0 : index
      %126 = vector.load %arg25[%125, %c0_99] : memref<48x24xf32, #tpu.memory_space<vmem>>, vector<1x24xf32>
      tpu.vector_store %arg25[%125, %c0_99], %124 {strides = array<i32>} : memref<48x24xf32, #tpu.memory_space<vmem>>, vector<1x24xf32>,
    }
    %c48_i32_47 = arith.constant 48 : i32
    %c0_48 = arith.constant 0 : index
    %c8_49 = arith.constant 8 : index
    %67 = vector.load %arg25[%c0_48, %c8_49] : memref<48x24xf32, #tpu.memory_space<vmem>>, vector<48x8xf32>
    %c0_50 = arith.constant 0 : index
    %c0_51 = arith.constant 0 : index
    %68 = vector.load %arg10[%c0_50, %c0_51] : memref<8x32xf32, #tpu.memory_space<vmem>>, vector<8x32xf32>
    %cst_52 = arith.constant dense<0.000000e+00> : vector<48x32xf32>
    %69 = tpu.matmul %67, %68, %cst_52 {dimension_numbers = #tpu.dot_dimension_numbers<[1], [0], [0], [1], [0, 0, 1, 1], [], []>} : vector<48x8xf32>, vector<8x32xf32>, vector<48x32xf32> -> vector<48x32xf32>
    %c0_53 = arith.constant 0 : index
    %c0_54 = arith.constant 0 : index
    %70 = vector.load %arg11[%c0_53, %c0_54] : memref<8x32xf32, #tpu.memory_space<vmem>>, vector<8x32xf32>
    %cst_55 = arith.constant dense<0.000000e+00> : vector<48x32xf32>
    %71 = tpu.matmul %60, %70, %cst_55 {dimension_numbers = #tpu.dot_dimension_numbers<[1], [0], [0], [1], [0, 0, 1, 1], [], []>} : vector<48x8xf32>, vector<8x32xf32>, vector<48x32xf32> -> vector<48x32xf32>
    %72 = arith.addf %69, %71 : vector<48x32xf32>
    %c0_56 = arith.constant 0 : index
    %c0_57 = arith.constant 0 : index
    %73 = vector.load %arg12[%c0_56, %c0_57] : memref<1x32xf32, #tpu.memory_space<vmem>>, vector<1x32xf32>
    %74 = vector.broadcast %73 : vector<1x32xf32> to vector<48x32xf32>
    %75 = arith.addf %72, %74 : vector<48x32xf32>
    %cst_58 = arith.constant 0.000000e+00 : f32
    %76 = vector.broadcast %cst_58 : f32 to vector<48x32xf32>
    %77 = arith.maximumf %75, %76 : vector<48x32xf32>
    %c0_59 = arith.constant 0 : index
    %c0_60 = arith.constant 0 : index
    %78 = vector.load %arg13[%c0_59, %c0_60] : memref<32x8xf32, #tpu.memory_space<vmem>>, vector<32x8xf32>
    %cst_61 = arith.constant dense<0.000000e+00> : vector<48x8xf32>
    %79 = tpu.matmul %77, %78, %cst_61 {dimension_numbers = #tpu.dot_dimension_numbers<[1], [0], [0], [1], [0, 0, 1, 1], [], []>} : vector<48x32xf32>, vector<32x8xf32>, vector<48x8xf32> -> vector<48x8xf32>
    %c0_62 = arith.constant 0 : index
    %c0_63 = arith.constant 0 : index
    %80 = vector.load %arg14[%c0_62, %c0_63] : memref<1x8xf32, #tpu.memory_space<vmem>>, vector<1x8xf32>
    %81 = vector.broadcast %80 : vector<1x8xf32> to vector<48x8xf32>
    %82 = arith.addf %79, %81 : vector<48x8xf32>
    %c0_64 = arith.constant 0 : index
    %c16 = arith.constant 16 : index
    %83 = vector.load %arg24[%c0_64, %c16] : memref<48x24xf32, #tpu.memory_space<vmem>>, vector<48x8xf32>
    tpu.vector_store %arg24[%c0_64, %c16], %82 {strides = array<i32>} : memref<48x24xf32, #tpu.memory_space<vmem>>, vector<48x8xf32>,
    %cst_65 = arith.constant dense<0.000000e+00> : vector<16x8xf32>
    %84 = tpu.matmul %7, %82, %cst_65 {dimension_numbers = #tpu.dot_dimension_numbers<[1], [0], [0], [1], [0, 0, 1, 1], [], []>} : vector<16x48xf32>, vector<48x8xf32>, vector<16x8xf32> -> vector<16x8xf32>
    %85 = vector.broadcast %13 : vector<16x1xf32> to vector<16x8xf32>
    %86 = arith.mulf %84, %85 : vector<16x8xf32>
    %c0_66 = arith.constant 0 : index
    %c16_67 = arith.constant 16 : index
    %87 = vector.load %arg23[%c0_66, %c16_67] : memref<16x24xf32, #tpu.memory_space<vmem>>, vector<16x8xf32>
    tpu.vector_store %arg23[%c0_66, %c16_67], %86 {strides = array<i32>} : memref<16x24xf32, #tpu.memory_space<vmem>>, vector<16x8xf32>,
    %c0_68 = arith.constant 0 : index
    %c0_69 = arith.constant 0 : index
    %88 = vector.load %arg23[%c0_68, %c0_69] : memref<16x24xf32, #tpu.memory_space<vmem>>, vector<16x24xf32>
    %cst_70 = arith.constant dense<0.000000e+00> : vector<2x24xf32>
    %89 = tpu.matmul %18, %88, %cst_70 {dimension_numbers = #tpu.dot_dimension_numbers<[1], [0], [0], [1], [0, 0, 1, 1], [], []>} : vector<2x16xf32>, vector<16x24xf32>, vector<2x24xf32> -> vector<2x24xf32>
    %90 = vector.broadcast %24 : vector<2x1xf32> to vector<2x24xf32>
    %91 = arith.mulf %89, %90 : vector<2x24xf32>
    %c0_71 = arith.constant 0 : index
    %c0_72 = arith.constant 0 : index
    %92 = vector.load %arg24[%c0_71, %c0_72] : memref<48x24xf32, #tpu.memory_space<vmem>>, vector<48x24xf32>
    %cst_73 = arith.constant dense<0.000000e+00> : vector<2x24xf32>
    %93 = tpu.matmul %29, %92, %cst_73 {dimension_numbers = #tpu.dot_dimension_numbers<[1], [0], [0], [1], [0, 0, 1, 1], [], []>} : vector<2x48xf32>, vector<48x24xf32>, vector<2x24xf32> -> vector<2x24xf32>
    %94 = vector.broadcast %35 : vector<2x1xf32> to vector<2x24xf32>
    %95 = arith.mulf %93, %94 : vector<2x24xf32>
    %c0_74 = arith.constant 0 : index
    %c0_75 = arith.constant 0 : index
    %96 = vector.load %arg15[%c0_74, %c0_75] : memref<24x32xf32, #tpu.memory_space<vmem>>, vector<24x32xf32>
    %cst_76 = arith.constant dense<0.000000e+00> : vector<2x32xf32>
    %97 = tpu.matmul %91, %96, %cst_76 {dimension_numbers = #tpu.dot_dimension_numbers<[1], [0], [0], [1], [0, 0, 1, 1], [], []>} : vector<2x24xf32>, vector<24x32xf32>, vector<2x32xf32> -> vector<2x32xf32>
    %c0_77 = arith.constant 0 : index
    %c0_78 = arith.constant 0 : index
    %98 = vector.load %arg16[%c0_77, %c0_78] : memref<24x32xf32, #tpu.memory_space<vmem>>, vector<24x32xf32>
    %cst_79 = arith.constant dense<0.000000e+00> : vector<2x32xf32>
    %99 = tpu.matmul %95, %98, %cst_79 {dimension_numbers = #tpu.dot_dimension_numbers<[1], [0], [0], [1], [0, 0, 1, 1], [], []>} : vector<2x24xf32>, vector<24x32xf32>, vector<2x32xf32> -> vector<2x32xf32>
    %100 = arith.addf %97, %99 : vector<2x32xf32>
    %c0_80 = arith.constant 0 : index
    %c0_81 = arith.constant 0 : index
    %101 = vector.load %arg17[%c0_80, %c0_81] : memref<1x32xf32, #tpu.memory_space<vmem>>, vector<1x32xf32>
    %102 = vector.broadcast %101 : vector<1x32xf32> to vector<2x32xf32>
    %103 = arith.addf %100, %102 : vector<2x32xf32>
    %cst_82 = arith.constant 0.000000e+00 : f32
    %104 = vector.broadcast %cst_82 : f32 to vector<2x32xf32>
    %105 = arith.maximumf %103, %104 : vector<2x32xf32>
    %c0_83 = arith.constant 0 : index
    %c0_84 = arith.constant 0 : index
    %106 = vector.load %arg18[%c0_83, %c0_84] : memref<32x32xf32, #tpu.memory_space<vmem>>, vector<32x32xf32>
    %cst_85 = arith.constant dense<0.000000e+00> : vector<2x32xf32>
    %107 = tpu.matmul %105, %106, %cst_85 {dimension_numbers = #tpu.dot_dimension_numbers<[1], [0], [0], [1], [0, 0, 1, 1], [], []>} : vector<2x32xf32>, vector<32x32xf32>, vector<2x32xf32> -> vector<2x32xf32>
    %c0_86 = arith.constant 0 : index
    %c0_87 = arith.constant 0 : index
    %108 = vector.load %arg19[%c0_86, %c0_87] : memref<1x32xf32, #tpu.memory_space<vmem>>, vector<1x32xf32>
    %109 = vector.broadcast %108 : vector<1x32xf32> to vector<2x32xf32>
    %110 = arith.addf %107, %109 : vector<2x32xf32>
    %cst_88 = arith.constant 0.000000e+00 : f32
    %111 = vector.broadcast %cst_88 : f32 to vector<2x32xf32>
    %112 = arith.maximumf %110, %111 : vector<2x32xf32>
    %c0_89 = arith.constant 0 : index
    %c0_90 = arith.constant 0 : index
    %113 = vector.load %arg20[%c0_89, %c0_90] : memref<32x4xf32, #tpu.memory_space<vmem>>, vector<32x4xf32>
    %cst_91 = arith.constant dense<0.000000e+00> : vector<2x4xf32>
    %114 = tpu.matmul %112, %113, %cst_91 {dimension_numbers = #tpu.dot_dimension_numbers<[1], [0], [0], [1], [0, 0, 1, 1], [], []>} : vector<2x32xf32>, vector<32x4xf32>, vector<2x4xf32> -> vector<2x4xf32>
    %c0_92 = arith.constant 0 : index
    %c0_93 = arith.constant 0 : index
    %115 = vector.load %arg21[%c0_92, %c0_93] : memref<1x4xf32, #tpu.memory_space<vmem>>, vector<1x4xf32>
    %116 = vector.broadcast %115 : vector<1x4xf32> to vector<2x4xf32>
    %117 = arith.addf %114, %116 : vector<2x4xf32>
    %c0_94 = arith.constant 0 : index
    %c0_95 = arith.constant 0 : index
    %118 = vector.load %arg22[%c0_94, %c0_95] : memref<2x52xf32, #tpu.memory_space<vmem>>, vector<2x24xf32>
    tpu.vector_store %arg22[%c0_94, %c0_95], %91 {strides = array<i32>} : memref<2x52xf32, #tpu.memory_space<vmem>>, vector<2x24xf32>,
    %c0_96 = arith.constant 0 : index
    %c24 = arith.constant 24 : index
    %119 = vector.load %arg22[%c0_96, %c24] : memref<2x52xf32, #tpu.memory_space<vmem>>, vector<2x24xf32>
    tpu.vector_store %arg22[%c0_96, %c24], %95 {strides = array<i32>} : memref<2x52xf32, #tpu.memory_space<vmem>>, vector<2x24xf32>,
    %c0_97 = arith.constant 0 : index
    %c48 = arith.constant 48 : index
    %120 = vector.load %arg22[%c0_97, %c48] : memref<2x52xf32, #tpu.memory_space<vmem>>, vector<2x4xf32>
    tpu.vector_store %arg22[%c0_97, %c48], %117 {strides = array<i32>} : memref<2x52xf32, #tpu.memory_space<vmem>>, vector<2x4xf32>,
    return
  }
}

</mosaic_0001>

<bundles_post_ra>
// kernel: tpu_custom_call.1
= control target key start
LH: loop header
LB: loop body
LE: loop exit
PB: predicated region body
PF: predicated region fallthrough
CT: control target
= control target key end

     0   :  { %s2723_s0 = inlined_call_operand.vmem [shape: s32[48], index: 0, kind: input, shape index: {}]   ;;  %s2724_s1 = inlined_call_operand.vmem [shape: s32[1,48], index: 1, kind: input, shape index: {}]   ;;  %s2725_s2 = inlined_call_operand.vmem [shape: s32[1,16], index: 2, kind: input, shape index: {}]   ;;  %s2726_s3 = inlined_call_operand.vmem [shape: s32[1,48], index: 3, kind: input, shape index: {}]   ;;  %s2727_s4 = inlined_call_operand.vmem [shape: f32[48,8], index: 4, kind: input, shape index: {}]   ;;  %s2728_s5 = inlined_call_operand.vmem [shape: f32[8,32], index: 5, kind: input, shape index: {}]   ;;  %s2729_s6 = inlined_call_operand.vmem [shape: f32[8,32], index: 6, kind: input, shape index: {}]   ;;  %s2730_s7 = inlined_call_operand.vmem [shape: f32[1,32], index: 7, kind: input, shape index: {}]   ;;  %s2731_s8 = inlined_call_operand.vmem [shape: f32[32,8], index: 8, kind: input, shape index: {}]   ;;  %s2732_s9 = inlined_call_operand.vmem [shape: f32[1,8], index: 9, kind: input, shape index: {}]   ;;  %s2733_s10 = inlined_call_operand.vmem [shape: f32[8,32], index: 10, kind: input, shape index: {}]   ;;  %s2734_s11 = inlined_call_operand.vmem [shape: f32[8,32], index: 11, kind: input, shape index: {}]   ;;  %s2735_s12 = inlined_call_operand.vmem [shape: f32[1,32], index: 12, kind: input, shape index: {}]   ;;  %s2736_s13 = inlined_call_operand.vmem [shape: f32[32,8], index: 13, kind: input, shape index: {}]   ;;  %s2737_s14 = inlined_call_operand.vmem [shape: f32[1,8], index: 14, kind: input, shape index: {}]   ;;  %s2738_s15 = inlined_call_operand.vmem [shape: f32[24,32], index: 15, kind: input, shape index: {}]   ;;  %s2739_s16 = inlined_call_operand.vmem [shape: f32[24,32], index: 16, kind: input, shape index: {}]   ;;  %s2740_s17 = inlined_call_operand.vmem [shape: f32[1,32], index: 17, kind: input, shape index: {}]   ;;  %s2741_s18 = inlined_call_operand.vmem [shape: f32[32,32], index: 18, kind: input, shape index: {}]   ;;  %s2742_s19 = inlined_call_operand.vmem [shape: f32[1,32], index: 19, kind: input, shape index: {}]   ;;  %s2743_s20 = inlined_call_operand.vmem [shape: f32[32,4], index: 20, kind: input, shape index: {}]   ;;  %s2744_s21 = inlined_call_operand.vmem [shape: f32[1,4], index: 21, kind: input, shape index: {}]   ;;  %s2745_s22 = inlined_call_operand.hbm [shape: f32[2,52], index: 22, kind: output, shape index: {}]  }
   0x1   :  { %2747 = sst [smem:[#allocation11_spill]] %s2723_s0 }
   0x2   :  { %2748 = sst [smem:[#allocation12_spill]] %s2724_s1 }
   0x3   :  { %2749 = sst [smem:[#allocation13_spill]] %s2725_s2 }
   0x4   :  { %2750 = sst [smem:[#allocation14_spill]] %s2726_s3 }
   0x5   :  { %2751 = sst [smem:[#allocation15_spill]] %s2727_s4 }
   0x6   :  { %2752 = sst [smem:[#allocation16_spill]] %s2728_s5 }
   0x7   :  { %2753 = sst [smem:[#allocation17_spill]] %s2729_s6 }
   0x8   :  { %27 = vsyncpa [#allocation7], 0 }
   0x9   :  { %28 = vsyncpa [#allocation6], 0  ;;  %s2754_s29 = sld [smem:[#allocation11_spill]] }
   0xf   :  { %s35_s30 = sshll.u32 %s2754_s29, 4  ;;  %s36_s30 = int_to_ptr.vmem [resolvable:$true] %s35_s30 }
  0x10   :  { %s2173_s4 = scalar_lea.vmem %s36_s30, 16  ;;  %p2178_p1 = scmp.lt.s32.totalorder %s36_s30, %s36_s30 }
  0x11   :  { %p2174_p0 = scmp.ne.s32.totalorder %s36_s30, %s2173_s4  ;;  %p2179_p2 = scmp.lt.s32.totalorder %s2173_s4, %s2173_s4 }
  0x13   :  { %p2180_p3 = por %p2179_p2, %p2178_p1 }
  0x15   :  { %p2181_p4 = pnand %p2180_p3, %p2174_p0 }
  0x17   :  { %2184 = shalt.err (!%p2181_p4)
}
  0x18   :  { %s2225_s0 = smov [#allocation5]  }
  0x19   :  { %38 = dma.vmem_to_smem %s36_s30, 16, %s2225_s0, [#allocation7]  }
  0x1a   :  { %2213 = dma.done.wait [#allocation7], 16  }
  0x1b   :  { %2214 = vsyncadd [#allocation7], 4294967280 }
  0x1c   :  { %84 = sfence }
  0x1d   :  { %s2755_s5 = sld [smem:[#allocation15_spill]]  ;;  %vm151_vm0 = vcmask 64512   ;;  %v88_v3 = vlaneseq  ;;  %vm101_vm1 = vcmask 392192   ;;  %vm121_vm2 = vcmask 123904   ;;  %s2217_s2 = smov 0  }
  0x1e   :  { %s2756_s23 = sld [smem:[#allocation12_spill]]  ;;  %v2226_v12 = vmov 0.0   ;;  %vm135_vm6 = vcmask 386048   ;;  %vm142_vm8 = vcmask 195584  }
  0x1f   :  { %v89_v8 = vshrl.u32 %v88_v3, 7  ;;  %s2758_s26 = sld [smem:[#allocation14_spill]]  ;;  %144 = vst.msk [vmem:[#allocation2 + $0x8] sm:$0xff] %vm142_vm8, %v2226_v12  ;;  %143 = vst.msk [vmem:[#allocation2] sm:$0xff] %vm142_vm8, %v2226_v12 }
  0x21   :  { %v90_v11 = vadd.s32 8, %v89_v8 }
  0x23   :  { %v2355_v0 = vld [vmem:[%s2755_s5 + $0x28] sm:$0xff]  ;;  %v2360_v1 = vld [vmem:[%s2755_s5 + $0x20] sm:$0xff]  ;;  %v2365_v2 = vld [vmem:[%s2755_s5 + $0x18] sm:$0xff] }
  0x24   :  { %157 = vst.msk [vmem:[#allocation3 + $0x28] sm:$0xff] %vm151_vm0, %v2355_v0  ;;  %1955 = vmatprep.subr.mxu0 %v2355_v0  ;;  %156 = vst.msk [vmem:[#allocation3 + $0x20] sm:$0xff] %vm151_vm0, %v2360_v1  ;;  %v2377_v4 = vld [vmem:[%s2755_s5 + $0x10] sm:$0xff]  ;;  %v2382_v5 = vld [vmem:[%s2755_s5 + $0x8] sm:$0xff] }
  0x25   :  { %155 = vst.msk [vmem:[#allocation3 + $0x18] sm:$0xff] %vm151_vm0, %v2365_v2  ;;  %v2387_v6 = vld [vmem:[%s2755_s5] sm:$0xff]  ;;  %1956 = vmatpush3.msra.mxu0 %v2355_v0  ;;  %154 = vst.msk [vmem:[#allocation3 + $0x10] sm:$0xff] %vm151_vm0, %v2377_v4  ;;  %s2757_s5 = sld [smem:[#allocation13_spill]] }
  0x26   :  { %153 = vst.msk [vmem:[#allocation3 + $0x8] sm:$0xff] %vm151_vm0, %v2382_v5  ;;  %152 = vst.msk [vmem:[#allocation3] sm:$0xff] %vm151_vm0, %v2387_v6  ;;  %v1793_v7 = vld [vmem:[%s2756_s23] ss:$0 sm:$0xff]  ;;  %1957 = vmatprep.subr.mxu0 %v2360_v1 }
  0x27   :  { %v1798_v10 = vld [vmem:[%s2758_s26] ss:$0 sm:$0xff]  ;;  %1958 = vmatpush3.msra.mxu0 %v2360_v1  ;;  %vm95_vm3 = vcmp.eq.s32.totalorder %v89_v8, %v1793_v7  ;;  %vm96_vm7 = vcmp.eq.s32.totalorder %v90_v11, %v1793_v7 }
  0x28   :  { %vm132_vm5 = vcmp.eq.s32.totalorder %v89_v8, %v1798_v10  ;;  %1959 = vmatprep.subr.mxu0 %v2365_v2  ;;  %v2409_v13 = vsel %vm95_vm3, 1.0, %v2226_v12  ;;  %v2426_v18 = vsel %vm96_vm7, 1.0, %v2226_v12 }
  0x29   :  { %1960 = vmatpush3.msra.mxu0 %v2365_v2  ;;  %1967 = vmatprep.mubr.msk.f32.mxu0 %vm101_vm1, %v2409_v13  ;;  %v102_v15 = vsel %vm101_vm1, %v2409_v13, 0.0  ;;  %v2422_v17 = vsel %vm132_vm5, 1.0, %v2226_v12  ;;  %v105_v19 = vsel %vm101_vm1, %v2426_v18, 0.0 }
  0x2a   :  { %1961 = vmatprep.subr.mxu0 %v2377_v4  ;;  %103 = vadd.xlane.f32.xlu0 %v102_v15  ;;  %v136_v20 = vsel %vm135_vm6, %v2422_v17, 0.0 }
  0x2b   :  { %v1796_v9 = vld [vmem:[%s2757_s5] ss:$0 sm:$0xff]  ;;  %1962 = vmatpush3.msra.mxu0 %v2377_v4 }
  0x2c   :  { %vm118_vm4 = vcmp.eq.s32.totalorder %v89_v8, %v1796_v9  ;;  %1963 = vmatprep.subr.mxu0 %v2382_v5 }
  0x2d   :  { %v2412_v14 = vsel %vm118_vm4, 1.0, %v2226_v12  ;;  %1964 = vmatpush3.msra.mxu0 %v2382_v5 }
  0x2e   :  { %v122_v16 = vsel %vm121_vm2, %v2412_v14, 0.0  ;;  %1965 = vmatprep.subr.mxu0 %v2387_v6  ;;  %106 = vadd.xlane.f32.xlu0 %v105_v19 }
  0x2f   :  { %123 = vadd.xlane.f32.xlu1 %v122_v16  ;;  %1966 = vmatpush3.msra.mxu0 %v2387_v6 }
  0x30   :  { %1968 = vmatmul.mubr.msk.f32.vlgmr.msra.gmra.mxu0 %vm101_vm1, %v2426_v18 }
  0x33   :  { %137 = vadd.xlane.f32.xlu1 %v136_v20 }
  0xb3   :  { %v104_v27 = vpop.xlane.xlu0 %103 }
  0xb4   :  { %v108_v30 = vmax.f32 %v104_v27, 1.0 }
  0xb7   :  { %v107_v28 = vpop.xlane.xlu0 %106 }
  0xb8   :  { %v124_v21 = vpop.xlane.xlu1 %123  ;;  %v109_v29 = vmax.f32 %v107_v28, 1.0 }
  0xb9   :  { %v125_v22 = vmax.f32 %v124_v21, 1.0 }
  0xbb   :  { %2165 = vrcp.f32 %v125_v22 }
  0xbc   :  { %v138_v23 = vpop.xlane.xlu1 %137 }
  0xbd   :  { %v139_v24 = vmax.f32 %v138_v23, 1.0 }
  0xbf   :  { %2167 = vrcp.f32 %v139_v24 }
  0xc0   :  { %2169 = vrcp.f32 %v109_v29 }
  0xc1   :  { %2171 = vrcp.f32 %v108_v30 }
  0xc8   :  { %v2442_v25 = vpop.eup %2165 }
  0xcc   :  { %v2444_v26 = vpop.eup %2167 }
  0xcd   :  { %v2446_v31 = vpop.eup %2169 }
  0xce   :  { %v2449_v34 = vpop.eup %2171 }
  0xf0   :  { %v1969_v32 = vpop.f32.mrf.mxu0 }
  0xf1   :  { %v240_v33 = vmul.f32 %v2446_v31, %v1969_v32 }
  0xf2   :  { %v230_v35 = vpop.f32.mrf.mxu0 }
  0xf3   :  { %242 = vst.msk [vmem:[#allocation2 + $0x8] sm:$0xff] %vm151_vm0, %v240_v33  ;;  %v239_v36 = vmul.f32 %v2449_v34, %v230_v35 }
  0xf5   :  { %241 = vst.msk [vmem:[#allocation2] sm:$0xff] %vm151_vm0, %v239_v36 }
  0xf6 LB: > { %s249_s27 = sld [smem:[#allocation5 + %s2219_s2]]  ;;  %vm253_vm9 = vcmask 188416   ;;  %s252_s28 = scalar_lea.vmem [#allocation4], %s2219_s2  ;;  %s2219_s2 = sphi %s2217_s2, %s248_s2  }
  0xf7   : > { %s248_s2 = sadd.s32 1, %s2219_s2  }
  0xf8   : > { %p245_p5 = scmp.ge.s32.totalorder %s248_s2, 48  }
  0xf9   :  { %s2759_s4 = sld [smem:[#allocation17_spill]] (%p245_p5)  ;;  %1972 = vmatprep.mubr.msk.f32.mxu1 (%p245_p5), %vm151_vm0, %v2387_v6  ;;  %v511_v46 = vld [vmem:[%s2731_s8 + $0x18] sm:$0xff] (%p245_p5)  ;;  %v510_v47 = vld [vmem:[%s2731_s8 + $0x10] sm:$0xff] (%p245_p5)  ;;  %v509_v48 = vld [vmem:[%s2731_s8 + $0x8] sm:$0xff] (%p245_p5)  ;;  %vm519_vm10 = vcmask (%p245_p5), 261120   ;;  %s2227_s30 = smov (%p245_p5), 8  }
  0xfa   :  { %247 = sbr.rel (!%p245_p5) target bundleno = 246 (0xf6), region = 130  ;;  %s2760_s1 = sld [smem:[#allocation16_spill]] (%p245_p5)  ;;  %1992 = vmatprep.subr.mxu0 (%p245_p5), %v511_v46  ;;  %v508_v49 = vld [vmem:[%s2731_s8] sm:$0xff] (%p245_p5)  ;;  %vm657_vm11 = vcmask (%p245_p5), 130112  }
  0xfb   :  { %1993 = vmatpush3.msra.mxu0 (%p245_p5), %v511_v46  ;;  %v1814_v58 = vld [vmem:[%s2730_s7] ss:$0 sm:$0xff] (%p245_p5) }
  0xfc   : > { %s250_s3 = scalar_lea.vmem [#allocation2], %s249_s27  ;;  %1994 = vmatprep.subr.mxu0 (%p245_p5), %v510_v47  ;;  %v1815_v22 = vld [vmem:[%s2732_s9] ss:$0 sm:$0xff] (%p245_p5)  ;;  %s2221_s9 = smov (%p245_p5), 0  }
  0xfd   : > { %v251_v37 = vld [vmem:[%s250_s3] sm:$0x1]  ;;  %1995 = vmatpush3.msra.mxu0 (%p245_p5), %v510_v47 }
  0xfe   : > { %254 = vst.msk [vmem:[%s252_s28] sm:$0x1] %vm253_vm9, %v251_v37  ;;  %1996 = vmatprep.subr.mxu0 (%p245_p5), %v509_v48 }
  0xff   :  { %v262_v38 = vld [vmem:[%s2759_s4] sm:$0xff]  ;;  %1997 = vmatpush3.msra.mxu0 %v509_v48 }
 0x100   :  { %v261_v39 = vld [vmem:[%s2760_s1] sm:$0xff]  ;;  %1970 = vmatprep.subr.mxu1 %v262_v38  ;;  %1998 = vmatprep.subr.mxu0 %v508_v49 }
 0x101   :  { %1971 = vmatpush3.msra.mxu1 %v262_v38  ;;  %1999 = vmatpush3.msra.mxu0 %v508_v49 }
 0x102   :  { %1973 = vmatmul.mubr.msk.f32.vlgmr.msra.gmra.mxu1 %vm151_vm0, %v2382_v5  ;;  %1981 = vmatprep.subr.mxu1 %v261_v39 }
 0x103   :  { %1982 = vmatpush3.msra.mxu1 %v261_v39  ;;  %1975 = vmatprep.mubr.msk.f32.mxu1 %vm151_vm0, %v2377_v4 }
 0x105   :  { %v255_v40 = vld [vmem:[#allocation4] sm:$0xff]  ;;  %v256_v41 = vld [vmem:[#allocation4 + $0x8] sm:$0xff]  ;;  %v257_v42 = vld [vmem:[#allocation4 + $0x10] sm:$0xff] }
 0x106   :  { %1976 = vmatmul.mubr.msk.f32.gmra.mxu1 %vm151_vm0, %v2365_v2  ;;  %v258_v43 = vld [vmem:[#allocation4 + $0x18] sm:$0xff]  ;;  %v259_v44 = vld [vmem:[#allocation4 + $0x20] sm:$0xff]  ;;  %v260_v45 = vld [vmem:[#allocation4 + $0x28] sm:$0xff] }
 0x107   :  { %1978 = vmatprep.mubr.msk.f32.mxu1 %vm151_vm0, %v2360_v1 }
 0x10a   :  { %1979 = vmatmul.mubr.msk.f32.gmra.mxu1 %vm151_vm0, %v2355_v0 }
 0x10b   :  { %1983 = vmatprep.mubr.msk.f32.mxu1 %vm151_vm0, %v255_v40 }
 0x10e   :  { %1984 = vmatmul.mubr.msk.f32.vlgmr.msra.gmra.mxu1 %vm151_vm0, %v256_v41 }
 0x10f   :  { %1986 = vmatprep.mubr.msk.f32.mxu1 %vm151_vm0, %v257_v42 }
 0x112   :  { %1987 = vmatmul.mubr.msk.f32.gmra.mxu1 %vm151_vm0, %v258_v43 }
 0x113   :  { %1989 = vmatprep.mubr.msk.f32.mxu1 %vm151_vm0, %v259_v44 }
 0x116   :  { %1990 = vmatmul.mubr.msk.f32.gmra.mxu1 %vm151_vm0, %v260_v45 }
 0x117   :  { %2021 = vmatprep.mubr.msk.f32.mxu1 %vm101_vm1, %v2409_v13 }
 0x1c2   :  { %v1974_v50 = vpop.f32.mrf.mxu1 }
 0x1c4   :  { %v347_v51 = vpop.f32.mrf.mxu1 }
 0x1c6   :  { %v1977_v52 = vpop.f32.mrf.mxu1 }
 0x1c8   :  { %v357_v53 = vpop.f32.mrf.mxu1 }
 0x1ca   :  { %v1980_v54 = vpop.f32.mrf.mxu1 }
 0x1cc   :  { %v367_v55 = vpop.f32.mrf.mxu1 }
 0x1ce   :  { %v1985_v56 = vpop.f32.mrf.mxu1 }
 0x1cf   :  { %v466_v57 = vadd.f32 %v1985_v56, %v1974_v50 }
 0x1d0   :  { %v460_v59 = vpop.f32.mrf.mxu1 }
 0x1d1   :  { %v461_v60 = vadd.f32 %v460_v59, %v347_v51  ;;  %v497_v61 = vadd.f32 %v1814_v58, %v466_v57 }
 0x1d2   :  { %v1988_v62 = vpop.f32.mrf.mxu1 }
 0x1d3   :  { %v476_v63 = vadd.f32 %v1988_v62, %v1977_v52  ;;  %v496_v0 = vadd.f32 %v1814_v58, %v461_v60  ;;  %v503_v4 = vmax.f32 %v497_v61, 0.0 }
 0x1d4   :  { %v470_v1 = vpop.f32.mrf.mxu1 }
 0x1d5   :  { %v471_v2 = vadd.f32 %v470_v1, %v357_v53  ;;  %v502_v3 = vmax.f32 %v496_v0, 0.0  ;;  %v499_v5 = vadd.f32 %v1814_v58, %v476_v63 }
 0x1d6   :  { %v1991_v6 = vpop.f32.mrf.mxu1 }
 0x1d7   :  { %v498_v7 = vadd.f32 %v1814_v58, %v471_v2  ;;  %v486_v8 = vadd.f32 %v1991_v6, %v1980_v54  ;;  %2000 = vmatprep.mubr.msk.f32.mxu0 %vm519_vm10, %v502_v3  ;;  %v505_v15 = vmax.f32 %v499_v5, 0.0 }
 0x1d8   :  { %v480_v9 = vpop.f32.mrf.mxu1  ;;  %2001 = vmatmul.mubr.msk.f32.vlgmr.msra.gmra.mxu0 %vm519_vm10, %v503_v4 }
 0x1d9   :  { %v504_v10 = vmax.f32 %v498_v7, 0.0  ;;  %v481_v11 = vadd.f32 %v480_v9, %v367_v55  ;;  %v501_v16 = vadd.f32 %v1814_v58, %v486_v8 }
 0x1db   :  { %v500_v19 = vadd.f32 %v1814_v58, %v481_v11  ;;  %2003 = vmatprep.mubr.msk.f32.mxu0 %vm519_vm10, %v504_v10  ;;  %v507_v21 = vmax.f32 %v501_v16, 0.0 }
 0x1dc   :  { %2004 = vmatmul.mubr.msk.f32.gmra.mxu0 %vm519_vm10, %v505_v15 }
 0x1dd   :  { %v506_v20 = vmax.f32 %v500_v19, 0.0 }
 0x1df   :  { %2006 = vmatprep.mubr.msk.f32.mxu0 %vm519_vm10, %v506_v20 }
 0x1e0   :  { %2007 = vmatmul.mubr.msk.f32.gmra.mxu0 %vm519_vm10, %v507_v21 }
 0x298   :  { %v2002_v23 = vpop.f32.mrf.mxu0 }
 0x299   :  { %v2505_v24 = vadd.f32 %v2002_v23, %v1815_v22 }
 0x29a   :  { %v604_v27 = vpop.f32.mrf.mxu0 }
 0x29b   :  { %641 = vrot.lane.b32.xlu0 %v2505_v24, %s2227_s30  ;;  %v2509_v29 = vadd.f32 %v1815_v22, %v604_v27 }
 0x29c   :  { %v2005_v28 = vpop.f32.mrf.mxu0 }
 0x29d   :  { %v2511_v30 = vadd.f32 %v2005_v28, %v1815_v22 }
 0x29e   :  { %v614_v32 = vpop.f32.mrf.mxu0 }
 0x29f   :  { %645 = vrot.lane.b32.xlu1 %v2511_v30, %s2227_s30  ;;  %639 = vrot.lane.b32.xlu0 %v2509_v29, %s2227_s30  ;;  %v2517_v35 = vadd.f32 %v1815_v22, %v614_v32 }
 0x2a0   :  { %v2008_v33 = vpop.f32.mrf.mxu0 }
 0x2a1   :  { %v2519_v36 = vadd.f32 %v2008_v33, %v1815_v22 }
 0x2a2   :  { %v624_v37 = vpop.f32.mrf.mxu0 }
 0x2a3   :  { %v2521_v38 = vadd.f32 %v1815_v22, %v624_v37  ;;  %2009 = vmatprep.subr.mxu1 %v2519_v36  ;;  %643 = vrot.lane.b32.xlu1 %v2517_v35, %s2227_s30 }
 0x2a4   :  { %2010 = vmatpush3.msra.mxu1 %v2519_v36 }
 0x2a5   :  { %2011 = vmatprep.subr.mxu1 %v2521_v38  ;;  %647 = vrot.lane.b32.xlu0 %v2521_v38, %s2227_s30 }
 0x2a6   :  { %2012 = vmatpush3.msra.mxu1 %v2521_v38 }
 0x2a7   :  { %2013 = vmatprep.subr.mxu1 %v2511_v30  ;;  %649 = vrot.lane.b32.xlu1 %v2519_v36, %s2227_s30 }
 0x2a8   :  { %2014 = vmatpush3.msra.mxu1 %v2511_v30 }
 0x2a9   :  { %2015 = vmatprep.subr.mxu1 %v2517_v35 }
 0x2aa   :  { %2016 = vmatpush3.msra.mxu1 %v2517_v35 }
 0x2ab   :  { %2017 = vmatprep.subr.mxu1 %v2505_v24 }
 0x2ac   :  { %2018 = vmatpush3.msra.mxu1 %v2505_v24 }
 0x2ad   :  { %2019 = vmatprep.subr.mxu1 %v2509_v29 }
 0x2ae   :  { %2020 = vmatpush3.msra.mxu1 %v2509_v29 }
 0x2af   :  { %2022 = vmatmul.mubr.msk.f32.vlgmr.msra.gmra.mxu1 %vm101_vm1, %v2426_v18 }
 0x30d   :  { %v642_v39 = vpop.permute.xlu0 %641 }
 0x30e   :  { %659 = vst.msk [vmem:[#allocation3 + $0x8] sm:$0xff] %vm657_vm11, %v642_v39 }
 0x311   :  { %v646_v40 = vpop.permute.xlu1 %645  ;;  %v640_v41 = vpop.permute.xlu0 %639 }
 0x312   :  { %661 = vst.msk [vmem:[#allocation3 + $0x18] sm:$0xff] %vm657_vm11, %v646_v40  ;;  %658 = vst.msk [vmem:[#allocation3] sm:$0xff] %vm657_vm11, %v640_v41 }
 0x315   :  { %v644_v42 = vpop.permute.xlu1 %643 }
 0x316   :  { %660 = vst.msk [vmem:[#allocation3 + $0x10] sm:$0xff] %vm657_vm11, %v644_v42 }
 0x317   :  { %v648_v43 = vpop.permute.xlu0 %647 }
 0x318   :  { %662 = vst.msk [vmem:[#allocation3 + $0x20] sm:$0xff] %vm657_vm11, %v648_v43 }
 0x319   :  { %v650_v44 = vpop.permute.xlu1 %649 }
 0x31a   :  { %663 = vst.msk [vmem:[#allocation3 + $0x28] sm:$0xff] %vm657_vm11, %v650_v44 }
 0x36f   :  { %v2023_v45 = vpop.f32.mrf.mxu1 }
 0x370   :  { %v740_v46 = vmul.f32 %v2446_v31, %v2023_v45 }
 0x371   :  { %v730_v47 = vpop.f32.mrf.mxu1 }
 0x372   :  { %v739_v48 = vmul.f32 %v2449_v34, %v730_v47  ;;  %745 = vrot.lane.b32.xlu1 %v740_v46, %s2227_s30 }
 0x374   :  { %743 = vrot.lane.b32.xlu0 %v739_v48, %s2227_s30 }
 0x3e4   :  { %v746_v49 = vpop.permute.xlu1 %745 }
 0x3e5   :  { %750 = vst.msk [vmem:[#allocation2 + $0x8] sm:$0xff] %vm657_vm11, %v746_v49 }
 0x3e6   :  { %v744_v50 = vpop.permute.xlu0 %743 }
 0x3e7   :  { %749 = vst.msk [vmem:[#allocation2] sm:$0xff] %vm657_vm11, %v744_v50 }
 0x3e8 LB: > { %s757_s4 = sld [smem:[#allocation5 + %s2223_s9]]  ;;  %s760_s23 = scalar_lea.vmem [#allocation4], %s2223_s9  ;;  %s2223_s9 = sphi %s2221_s9, %s756_s9  }
 0x3e9   : > { %s756_s9 = sadd.s32 1, %s2223_s9  }
 0x3ea   : > { %p753_p6 = scmp.ge.s32.totalorder %s756_s9, 48  }
 0x3eb   :  { %2026 = vmatprep.mubr.msk.f32.mxu1 (%p753_p6), %vm151_vm0, %v2509_v29  ;;  %s2228_s1 = smov (%p753_p6), 120   ;;  %v770_v56 = vld [vmem:[%s2734_s11] sm:$0xff] (%p753_p6)  ;;  %v1025_v60 = vld [vmem:[%s2736_s13 + $0x18] sm:$0xff] (%p753_p6)  ;;  %v1024_v3 = vld [vmem:[%s2736_s13 + $0x10] sm:$0xff] (%p753_p6)  ;;  %s2229_s30 = smov (%p753_p6), 16   ;;  %vm1170_vm12 = vcmask (%p753_p6), 195712  }
 0x3ec   :  { %755 = sbr.rel (!%p753_p6) target bundleno = 1000 (0x3e8), region = 141  ;;  %v769_v57 = vld [vmem:[%s2733_s10] sm:$0xff] (%p753_p6)  ;;  %2024 = vmatprep.subr.mxu1 (%p753_p6), %v770_v56  ;;  %v1023_v4 = vld [vmem:[%s2736_s13 + $0x8] sm:$0xff] (%p753_p6)  ;;  %vm2230_vm13 = vmmov (%p753_p6), 0   ;;  %vm1266_vm14 = vcmask (%p753_p6), 130048   ;;  %s2231_s6 = smov (%p753_p6), 24  }
 0x3ed   :  { %2035 = vmatprep.subr.mxu0 (%p753_p6), %v769_v57  ;;  %2025 = vmatpush3.msra.mxu1 (%p753_p6), %v770_v56  ;;  %v1022_v5 = vld [vmem:[%s2736_s13] sm:$0xff] (%p753_p6)  ;;  %vm1751_vm15 = vcmask (%p753_p6), 189440  }
 0x3ee   : > { %s758_s0 = scalar_lea.vmem [#allocation2], %s757_s4  ;;  %2036 = vmatpush3.msra.mxu0 (%p753_p6), %v769_v57  ;;  %2027 = vmatmul.mubr.msk.f32.vlgmr.msra.gmra.mxu1 (%p753_p6), %vm151_vm0, %v2505_v24  ;;  %v1836_v10 = vld [vmem:[%s2735_s12] ss:$0 sm:$0xff] (%p753_p6) }
 0x3ef   : > { %v759_v51 = vld [vmem:[%s758_s0] sm:$0x1]  ;;  %2029 = vmatprep.mubr.msk.f32.mxu1 (%p753_p6), %vm151_vm0, %v2517_v35  ;;  %2046 = vmatprep.subr.mxu1 (%p753_p6), %v1025_v60 }
 0x3f0   : > { %762 = vst.msk [vmem:[%s760_s23] sm:$0x1] %vm253_vm9, %v759_v51  ;;  %2047 = vmatpush3.msra.mxu1 (%p753_p6), %v1025_v60  ;;  %v1837_v49 = vld [vmem:[%s2737_s14] ss:$0 sm:$0xff] (%p753_p6) }
 0x3f1   :  { %2048 = vmatprep.subr.mxu1 %v1024_v3 }
 0x3f2   :  { %2030 = vmatmul.mubr.msk.f32.gmra.mxu1 %vm151_vm0, %v2511_v30 }
 0x3f3   :  { %2032 = vmatprep.mubr.msk.f32.mxu1 %vm151_vm0, %v2521_v38  ;;  %2049 = vmatpush3.msra.mxu1 %v1024_v3 }
 0x3f4   :  { %2050 = vmatprep.subr.mxu1 %v1023_v4 }
 0x3f5   :  { %2051 = vmatpush3.msra.mxu1 %v1023_v4 }
 0x3f6   :  { %2033 = vmatmul.mubr.msk.f32.gmra.mxu1 %vm151_vm0, %v2519_v36  ;;  %2052 = vmatprep.subr.mxu1 %v1022_v5 }
 0x3f7   :  { %v763_v52 = vld [vmem:[#allocation4] sm:$0xff]  ;;  %v765_v53 = vld [vmem:[#allocation4 + $0x10] sm:$0xff]  ;;  %v764_v54 = vld [vmem:[#allocation4 + $0x8] sm:$0xff]  ;;  %2053 = vmatpush3.msra.mxu1 %v1022_v5 }
 0x3f8   :  { %884 = vrot.lane.b32.xlu0 %v763_v52, %s2228_s1  ;;  %888 = vrot.lane.b32.xlu1 %v765_v53, %s2228_s1  ;;  %v766_v55 = vld [vmem:[#allocation4 + $0x18] sm:$0xff]  ;;  %v767_v58 = vld [vmem:[#allocation4 + $0x20] sm:$0xff]  ;;  %v768_v59 = vld [vmem:[#allocation4 + $0x28] sm:$0xff] }
 0x3f9   :  { %2085 = vmatprep.subr.mxu1 %v2226_v12 }
 0x3fc   :  { %886 = vrot.lane.b32.xlu0 %v764_v54, %s2228_s1  ;;  %890 = vrot.lane.b32.xlu1 %v766_v55, %s2228_s1 }
 0x400   :  { %892 = vrot.lane.b32.xlu0 %v767_v58, %s2228_s1  ;;  %894 = vrot.lane.b32.xlu1 %v768_v59, %s2228_s1 }
 0x46a   :  { %v885_v61 = vpop.permute.xlu0 %884  ;;  %v889_v62 = vpop.permute.xlu1 %888 }
 0x46b   :  { %2037 = vmatprep.mubr.msk.f32.mxu0 %vm151_vm0, %v885_v61 }
 0x46e   :  { %v887_v63 = vpop.permute.xlu0 %886  ;;  %v891_v0 = vpop.permute.xlu1 %890 }
 0x46f   :  { %2038 = vmatmul.mubr.msk.f32.vlgmr.msra.gmra.mxu0 %vm151_vm0, %v887_v63 }
 0x470   :  { %2040 = vmatprep.mubr.msk.f32.mxu0 %vm151_vm0, %v889_v62 }
 0x472   :  { %v893_v1 = vpop.permute.xlu0 %892  ;;  %v895_v2 = vpop.permute.xlu1 %894 }
 0x473   :  { %2041 = vmatmul.mubr.msk.f32.gmra.mxu0 %vm151_vm0, %v891_v0 }
 0x474   :  { %2043 = vmatprep.mubr.msk.f32.mxu0 %vm151_vm0, %v893_v1 }
 0x477   :  { %2044 = vmatmul.mubr.msk.f32.gmra.mxu0 %vm151_vm0, %v895_v2  ;;  %vm1756_vm0 = vcmask 386240  }
 0x478   :  { %2075 = vmatprep.mubr.msk.f32.mxu0 %vm101_vm1, %v2409_v13 }
 0x4ae   :  { %v2028_v13 = vpop.f32.mrf.mxu1 }
 0x4b0   :  { %v849_v6 = vpop.f32.mrf.mxu1 }
 0x4b2   :  { %v2031_v7 = vpop.f32.mrf.mxu1 }
 0x4b4   :  { %v859_v15 = vpop.f32.mrf.mxu1 }
 0x4b6   :  { %v2034_v23 = vpop.f32.mrf.mxu1 }
 0x4b8   :  { %v869_v36 = vpop.f32.mrf.mxu1 }
 0x52f   :  { %v2039_v8 = vpop.f32.mrf.mxu0 }
 0x530   :  { %v980_v9 = vadd.f32 %v2039_v8, %v2028_v13 }
 0x531   :  { %v974_v11 = vpop.f32.mrf.mxu0 }
 0x532   :  { %v975_v16 = vadd.f32 %v974_v11, %v849_v6  ;;  %v1011_v19 = vadd.f32 %v1836_v10, %v980_v9  ;;  %v1424_v11 = vld [vmem:[%s2739_s16] sm:$0xff] }
 0x533   :  { %v2042_v20 = vpop.f32.mrf.mxu0 }
 0x534   :  { %v1010_v21 = vadd.f32 %v1836_v10, %v975_v16  ;;  %v990_v22 = vadd.f32 %v2042_v20, %v2031_v7  ;;  %v1017_v29 = vmax.f32 %v1011_v19, 0.0  ;;  %v1423_v16 = vld [vmem:[%s2738_s15 + $0x10] sm:$0xff]  ;;  %v1422_v20 = vld [vmem:[%s2738_s15 + $0x8] sm:$0xff] }
 0x535   :  { %v984_v24 = vpop.f32.mrf.mxu0 }
 0x536   :  { %v1016_v27 = vmax.f32 %v1010_v21, 0.0  ;;  %v985_v28 = vadd.f32 %v984_v24, %v859_v15  ;;  %v1013_v30 = vadd.f32 %v1836_v10, %v990_v22 }
 0x537   :  { %v2045_v32 = vpop.f32.mrf.mxu0 }
 0x538   :  { %v1012_v33 = vadd.f32 %v1836_v10, %v985_v28  ;;  %v1000_v35 = vadd.f32 %v2045_v32, %v2034_v23  ;;  %2054 = vmatprep.mubr.msk.f32.mxu1 %vm519_vm10, %v1016_v27  ;;  %v1019_v40 = vmax.f32 %v1013_v30, 0.0  ;;  %v1583_v30 = vld [vmem:[%s2741_s18 + $0x8] sm:$0xff]  ;;  %v1582_v32 = vld [vmem:[%s2741_s18] sm:$0xff] }
 0x539   :  { %v994_v37 = vpop.f32.mrf.mxu0  ;;  %2055 = vmatmul.mubr.msk.f32.vlgmr.msra.gmra.mxu1 %vm519_vm10, %v1017_v29  ;;  %v1585_v29 = vld [vmem:[%s2741_s18 + $0x18] sm:$0xff] }
 0x53a   :  { %v1018_v38 = vmax.f32 %v1012_v33, 0.0  ;;  %v995_v39 = vadd.f32 %v994_v37, %v869_v36  ;;  %v1015_v41 = vadd.f32 %v1836_v10, %v1000_v35  ;;  %v1670_v33 = vld [vmem:[%s2743_s20 + $0x18] sm:$0xff]  ;;  %v1850_v36 = vld [vmem:[%s2740_s17] ss:$0 sm:$0xff] }
 0x53c   :  { %v1014_v42 = vadd.f32 %v1836_v10, %v995_v39  ;;  %2057 = vmatprep.mubr.msk.f32.mxu1 %vm519_vm10, %v1018_v38  ;;  %v1021_v44 = vmax.f32 %v1015_v41, 0.0  ;;  %v1669_v41 = vld [vmem:[%s2743_s20 + $0x10] sm:$0xff] }
 0x53d   :  { %2058 = vmatmul.mubr.msk.f32.gmra.mxu1 %vm519_vm10, %v1019_v40 }
 0x53e   :  { %v1020_v43 = vmax.f32 %v1014_v42, 0.0  ;;  %v1668_v42 = vld [vmem:[%s2743_s20 + $0x8] sm:$0xff] }
 0x540   :  { %2060 = vmatprep.mubr.msk.f32.mxu1 %vm519_vm10, %v1020_v43  ;;  %v1667_v43 = vld [vmem:[%s2743_s20] sm:$0xff]  ;;  %s2233_s20 = smov [#allocation8]  }
 0x541   :  { %2061 = vmatmul.mubr.msk.f32.gmra.mxu1 %vm519_vm10, %v1021_v44  ;;  %v1851_v44 = vld [vmem:[%s2742_s19] ss:$0 sm:$0xff] }
 0x542   :  { %2097 = vmatprep.mubr.msk.f32.mxu1 %vm2230_vm13, %v2226_v12 }
 0x5f9   :  { %v2056_v45 = vpop.f32.mrf.mxu1 }
 0x5fa   :  { %v1123_v56 = vadd.f32 %v2056_v45, %v1837_v49 }
 0x5fb   :  { %v1117_v46 = vpop.f32.mrf.mxu1 }
 0x5fc   :  { %v1118_v57 = vadd.f32 %v1837_v49, %v1117_v46 }
 0x5fd   :  { %v2059_v47 = vpop.f32.mrf.mxu1 }
 0x5fe   :  { %v1133_v54 = vadd.f32 %v2059_v47, %v1837_v49 }
 0x5ff   :  { %v1127_v48 = vpop.f32.mrf.mxu1 }
 0x600   :  { %v1128_v55 = vadd.f32 %v1837_v49, %v1127_v48 }
 0x601   :  { %v2062_v50 = vpop.f32.mrf.mxu1 }
 0x602   :  { %v1143_v51 = vadd.f32 %v2062_v50, %v1837_v49 }
 0x603   :  { %v1137_v52 = vpop.f32.mrf.mxu1 }
 0x604   :  { %v1138_v53 = vadd.f32 %v1837_v49, %v1137_v52  ;;  %1162 = vrot.lane.b32.xlu0 %v1143_v51, %s2229_s30  ;;  %2063 = vmatprep.subr.mxu0 %v1143_v51  ;;  %v1853_v49 = vld [vmem:[%s2744_s21] ss:$0 sm:$0xff] }
 0x605   :  { %2064 = vmatpush3.msra.mxu0 %v1143_v51 }
 0x606   :  { %1160 = vrot.lane.b32.xlu1 %v1138_v53, %s2229_s30  ;;  %2065 = vmatprep.subr.mxu0 %v1138_v53 }
 0x607   :  { %2066 = vmatpush3.msra.mxu0 %v1138_v53 }
 0x608   :  { %1158 = vrot.lane.b32.xlu0 %v1133_v54, %s2229_s30  ;;  %2067 = vmatprep.subr.mxu0 %v1133_v54 }
 0x609   :  { %2068 = vmatpush3.msra.mxu0 %v1133_v54 }
 0x60a   :  { %1156 = vrot.lane.b32.xlu1 %v1128_v55, %s2229_s30  ;;  %2069 = vmatprep.subr.mxu0 %v1128_v55 }
 0x60b   :  { %2070 = vmatpush3.msra.mxu0 %v1128_v55 }
 0x60c   :  { %1154 = vrot.lane.b32.xlu0 %v1123_v56, %s2229_s30  ;;  %2071 = vmatprep.subr.mxu0 %v1123_v56 }
 0x60d   :  { %2072 = vmatpush3.msra.mxu0 %v1123_v56 }
 0x60e   :  { %1152 = vrot.lane.b32.xlu1 %v1118_v57, %s2229_s30  ;;  %2073 = vmatprep.subr.mxu0 %v1118_v57 }
 0x60f   :  { %2074 = vmatpush3.msra.mxu0 %v1118_v57 }
 0x610   :  { %2076 = vmatmul.mubr.msk.f32.vlgmr.msra.gmra.mxu0 %vm101_vm1, %v2426_v18  ;;  %2078 = vmatprep.subr.mxu0 %v2226_v12 }
 0x611   :  { %2082 = vmatprep.mubr.msk.f32.mxu0 %vm2230_vm13, %v2226_v12 }
 0x676   :  { %v1163_v58 = vpop.permute.xlu0 %1162 }
 0x677   :  { %1176 = vst.msk [vmem:[#allocation3 + $0x28] sm:$0xff] %vm1170_vm12, %v1163_v58 }
 0x678   :  { %v1161_v59 = vpop.permute.xlu1 %1160 }
 0x679   :  { %1175 = vst.msk [vmem:[#allocation3 + $0x20] sm:$0xff] %vm1170_vm12, %v1161_v59 }
 0x67a   :  { %v1159_v60 = vpop.permute.xlu0 %1158 }
 0x67b   :  { %1174 = vst.msk [vmem:[#allocation3 + $0x18] sm:$0xff] %vm1170_vm12, %v1159_v60 }
 0x67c   :  { %v1157_v61 = vpop.permute.xlu1 %1156 }
 0x67d   :  { %1173 = vst.msk [vmem:[#allocation3 + $0x10] sm:$0xff] %vm1170_vm12, %v1157_v61 }
 0x67e   :  { %v1155_v62 = vpop.permute.xlu0 %1154  ;;  %v1346_v63 = vld [vmem:[#allocation3 + $0x28] sm:$0xff] }
 0x67f   :  { %1172 = vst.msk [vmem:[#allocation3 + $0x8] sm:$0xff] %vm1170_vm12, %v1155_v62  ;;  %2086 = vmatpush3.msra.mxu1 %v1346_v63 }
 0x680   :  { %2087 = vmatprep.subr.mxu1 %v2226_v12  ;;  %v1153_v18 = vpop.permute.xlu1 %1152  ;;  %v1345_v0 = vld [vmem:[#allocation3 + $0x20] sm:$0xff] }
 0x681   :  { %1171 = vst.msk [vmem:[#allocation3] sm:$0xff] %vm1170_vm12, %v1153_v18  ;;  %2088 = vmatpush3.msra.mxu1 %v1345_v0 }
 0x682   :  { %2089 = vmatprep.subr.mxu1 %v2226_v12  ;;  %v1344_v1 = vld [vmem:[#allocation3 + $0x18] sm:$0xff] }
 0x683   :  { %2090 = vmatpush3.msra.mxu1 %v1344_v1 }
 0x684   :  { %2091 = vmatprep.subr.mxu1 %v2226_v12  ;;  %v1343_v2 = vld [vmem:[#allocation3 + $0x10] sm:$0xff] }
 0x685   :  { %2092 = vmatpush3.msra.mxu1 %v1343_v2 }
 0x686   :  { %2093 = vmatprep.subr.mxu1 %v2226_v12  ;;  %v1342_v3 = vld [vmem:[#allocation3 + $0x8] sm:$0xff] }
 0x687   :  { %2094 = vmatpush3.msra.mxu1 %v1342_v3 }
 0x688   :  { %2095 = vmatprep.subr.mxu1 %v2226_v12  ;;  %v1341_v4 = vld [vmem:[#allocation3] sm:$0xff] }
 0x689   :  { %2096 = vmatpush3.msra.mxu1 %v1341_v4 }
 0x68a   :  { %2118 = vmatprep.subr.mxu1 %v2226_v12  ;;  %2098 = vmatmul.mubr.msk.f32.vlgmr.msra.gmra.mxu1 %vm101_vm1, %v2422_v17  ;;  %vm1762_vm1 = vcmask 419200  }
 0x68b   :  { %2126 = vmatprep.mubr.msk.f32.mxu1 %vm2230_vm13, %v2226_v12  ;;  %2119 = vmatpush3.msra.mxu1 %v1585_v29 }
 0x68c   :  { %2120 = vmatprep.subr.mxu1 %v2226_v12 }
 0x6d0   :  { %v2077_v5 = vpop.f32.mrf.mxu0 }
 0x6d1   :  { %v1253_v13 = vmul.f32 %v2446_v31, %v2077_v5  ;;  %v1426_v31 = vld [vmem:[%s2739_s16 + $0x10] sm:$0xff] }
 0x6d2   :  { %v1243_v6 = vpop.f32.mrf.mxu0 }
 0x6d3   :  { %v1252_v7 = vmul.f32 %v2449_v34, %v1243_v6  ;;  %1258 = vrot.lane.b32.xlu0 %v1253_v13, %s2229_s30  ;;  %v1425_v34 = vld [vmem:[%s2739_s16 + $0x8] sm:$0xff]  ;;  %s1770_s16 = sshll.u32 %s2233_s20, 4  ;;  %s1771_s16 = int_to_ptr.vmem [resolvable:$true] %s1770_s16 }
 0x6d4   :  { %s2185_s19 = scalar_lea.vmem %s1771_s16, 32  ;;  %p2190_p8 = scmp.lt.s32.totalorder %s1771_s16, %s1771_s16 }
 0x6d5   :  { %1256 = vrot.lane.b32.xlu1 %v1252_v7, %s2229_s30  ;;  %p2186_p7 = scmp.ne.s32.totalorder %s1771_s16, %s2185_s19  ;;  %p2191_p9 = scmp.lt.s32.totalorder %s2185_s19, %s2185_s19 }
 0x6d7   :  { %p2192_p10 = por %p2191_p9, %p2190_p8 }
 0x6d9   :  { %p2193_p11 = pnand %p2192_p10, %p2186_p7 }
 0x745   :  { %v1259_v8 = vpop.permute.xlu0 %1258 }
 0x746   :  { %1263 = vst.msk [vmem:[#allocation2 + $0x8] sm:$0xff] %vm1170_vm12, %v1259_v8 }
 0x747   :  { %v1257_v9 = vpop.permute.xlu1 %1256 }
 0x748   :  { %1262 = vst.msk [vmem:[#allocation2] sm:$0xff] %vm1170_vm12, %v1257_v9 }
 0x74d   :  { %v1265_v17 = vld [vmem:[#allocation2 + $0x8] sm:$0xff] }
 0x74e   :  { %2079 = vmatpush3.msra.mxu0 %v1265_v17 }
 0x74f   :  { %2080 = vmatprep.subr.mxu0 %v2226_v12  ;;  %v1264_v10 = vld [vmem:[#allocation2] sm:$0xff] }
 0x750   :  { %2081 = vmatpush3.msra.mxu0 %v1264_v10 }
 0x751   :  { %2083 = vmatmul.mubr.msk.f32.vlgmr.msra.gmra.mxu0 %vm1266_vm14, %v2412_v14  ;;  %2100 = vmatprep.subr.mxu0 %v2226_v12  ;;  %v1416_v14 = vpop.f32.mrf.mxu1 }
 0x752   :  { %2101 = vmatpush3.msra.mxu0 %v1426_v31  ;;  %2106 = vmatprep.mubr.msk.f32.mxu0 %vm2230_vm13, %v2226_v12  ;;  %v1420_v15 = vmul.f32 %v2444_v26, %v1416_v14  ;;  %v1421_v26 = vld [vmem:[%s2738_s15] sm:$0xff] }
 0x753   :  { %2102 = vmatprep.subr.mxu0 %v2226_v12  ;;  %v2099_v19 = vpop.f32.mrf.mxu1 }
 0x754   :  { %2103 = vmatpush3.msra.mxu0 %v1425_v34  ;;  %1753 = vrot.lane.b32.xlu0 %v1420_v15, %s2231_s6  ;;  %s2232_s6 = smov 48  }
 0x755   :  { %2104 = vmatprep.subr.mxu0 %v2226_v12 }
 0x756   :  { %2105 = vmatpush3.msra.mxu0 %v1424_v11 }
 0x757   :  { %2109 = vmatprep.subr.mxu0 %v2226_v12  ;;  %2107 = vmatmul.mubr.msk.f32.vlgmr.msra.gmra.mxu0 %vm142_vm8, %v1420_v15 }
 0x758   :  { %2110 = vmatpush3.msra.mxu0 %v1423_v16  ;;  %2115 = vmatprep.mubr.msk.f32.mxu0 %vm2230_vm13, %v2226_v12 }
 0x759   :  { %2111 = vmatprep.subr.mxu0 %v2226_v12 }
 0x75a   :  { %2112 = vmatpush3.msra.mxu0 %v1422_v20 }
 0x75b   :  { %2113 = vmatprep.subr.mxu0 %v2226_v12 }
 0x75c   :  { %2114 = vmatpush3.msra.mxu0 %v1421_v26 }
 0x75d   :  { %2129 = vmatprep.subr.mxu0 %v2226_v12 }
 0x7c6   :  { %v1754_v23 = vpop.permute.xlu0 %1753 }
 0x811   :  { %v1336_v21 = vpop.f32.mrf.mxu0 }
 0x812   :  { %v1340_v22 = vmul.f32 %v2442_v25, %v1336_v21  ;;  %v1584_v25 = vld [vmem:[%s2741_s18 + $0x10] sm:$0xff] }
 0x813   :  { %v2084_v24 = vpop.f32.mrf.mxu0  ;;  %2121 = vmatpush3.msra.mxu1 %v1584_v25 }
 0x814   :  { %1752 = vst.msk [vmem:[#allocation8] sm:$0x3] %vm1751_vm15, %v1340_v22  ;;  %2116 = vmatmul.mubr.msk.f32.vlgmr.msra.gmra.mxu0 %vm142_vm8, %v1340_v22  ;;  %2122 = vmatprep.subr.mxu1 %v2226_v12 }
 0x815   :  { %1757 = vst.msk [vmem:[#allocation8] sm:$0x3] %vm1756_vm0, %v1754_v23  ;;  %2137 = vmatprep.mubr.msk.f32.mxu0 %vm2230_vm13, %v2226_v12  ;;  %2123 = vmatpush3.msra.mxu1 %v1583_v30 }
 0x816   :  { %2124 = vmatprep.subr.mxu1 %v2226_v12  ;;  %2130 = vmatpush3.msra.mxu0 %v1670_v33 }
 0x817   :  { %v1496_v27 = vpop.f32.mrf.mxu0  ;;  %2125 = vmatpush3.msra.mxu1 %v1582_v32  ;;  %2131 = vmatprep.subr.mxu0 %v2226_v12 }
 0x818   :  { %2132 = vmatpush3.msra.mxu0 %v1669_v41 }
 0x819   :  { %v2108_v28 = vpop.f32.mrf.mxu0  ;;  %2133 = vmatprep.subr.mxu0 %v2226_v12 }
 0x81a   :  { %2134 = vmatpush3.msra.mxu0 %v1668_v42 }
 0x81b   :  { %2135 = vmatprep.subr.mxu0 %v2226_v12 }
 0x81c   :  { %2136 = vmatpush3.msra.mxu0 %v1667_v43 }
 0x8d4   :  { %v1569_v35 = vpop.f32.mrf.mxu0 }
 0x8d5   :  { %v1570_v37 = vadd.f32 %v1569_v35, %v1496_v27 }
 0x8d6   :  { %v2117_v38 = vpop.f32.mrf.mxu0 }
 0x8d7   :  { %v1580_v39 = vadd.f32 %v1850_v36, %v1570_v37 }
 0x8d9   :  { %v1581_v40 = vmax.f32 %v1580_v39, 0.0 }
 0x8db   :  { %2127 = vmatmul.mubr.msk.f32.vlgmr.msra.gmra.mxu1 %vm519_vm10, %v1581_v40 }
 0x99b   :  { %v1662_v45 = vpop.f32.mrf.mxu1 }
 0x99c   :  { %v1663_v46 = vadd.f32 %v1851_v44, %v1662_v45 }
 0x99d   :  { %v2128_v47 = vpop.f32.mrf.mxu1 }
 0x99e   :  { %v1666_v48 = vmax.f32 %v1663_v46, 0.0 }
 0x9a0   :  { %2138 = vmatmul.mubr.msk.f32.vlgmr.msra.gmra.mxu0 %vm519_vm10, %v1666_v48 }
 0xa60   :  { %v1747_v12 = vpop.f32.mrf.mxu0 }
 0xa61   :  { %v1748_v50 = vadd.f32 %v1853_v49, %v1747_v12 }
 0xa62   :  { %v2139_v51 = vpop.f32.mrf.mxu0 }
 0xa63   :  { %1759 = vrot.lane.b32.xlu1 %v1748_v50, %s2232_s6 }
 0xad5   :  { %v1760_v52 = vpop.permute.xlu1 %1759 }
 0xad6   :  { %1763 = vst.msk [vmem:[#allocation8] sm:$0x3] %vm1762_vm1, %v1760_v52 }
 0xad7   :  { %2196 = shalt.err (!%p2193_p11)
}
 0xad8   :  { %1773 = dma.vmem_to_hbm [thread:$0]  %s1771_s16, 32, %s2745_s22, [#allocation6]  }
 0xad9   :  { %2215 = dma.done.wait [#allocation6], 32  }
 0xada   :  { %2216 = vsyncadd [#allocation6], 4294967264 }
 0xadb   :  { %1777 = vsyncpa [#allocation6], 1 }
 0xadc   :  { %1778 = vsyncpa [#allocation7], 1 }

</bundles_post_ra>
